<compile_context>
chip_gen: v6e
topology: v6e:2x2x1
jax: 0.10.0
libtpu: 0.0.40
codegen_flags: <defaults>
</compile_context>

<pallas_src>
import jax
import jax.numpy as jnp
from jax.experimental import pallas as pl
from jax.experimental.pallas import tpu as pltpu


def _critic_mlp_kernel(x_ref, w1_ref, b1_ref, w2_ref, b2_ref, w3_ref, b3_ref,
                       o_ref):
    """One batch tile of the fused 3-layer value-head MLP.

    x_ref  : (TB, D)  f32   observation tile (pipelined over batch grid)
    w1_ref : (D, H)   bf16  \
    w2_ref : (H, H)   bf16   } VMEM-resident across grid steps
    w3_ref : (H, 1)   bf16  /  final layer as a column -> MXU matmul
    b1/b2  : (1, H)   f32   biases (VMEM, VPU broadcast)
    b3_ref : (1, 1)   f32   scalar bias in SMEM
    o_ref  : (TB, 1)  f32   value tile
    """
    x = x_ref[...].astype(jnp.bfloat16)                                # in-kernel cast (VPU)
    h1 = jnp.dot(x, w1_ref[...], preferred_element_type=jnp.float32)  # MXU, f32 acc
    h1 = jnp.maximum(h1 + b1_ref[...], 0.0)                           # ReLU (VPU)
    h2 = jnp.dot(h1.astype(jnp.bfloat16), w2_ref[...],
                 preferred_element_type=jnp.float32)                  # MXU, f32 acc
    h2 = jnp.maximum(h2 + b2_ref[...], 0.0)                           # ReLU (VPU)
    # Final out_size=1 layer on the (idle) MXU; avoids per-row XLU reductions.
    val = jnp.dot(h2.astype(jnp.bfloat16), w3_ref[...],
                  preferred_element_type=jnp.float32) + b3_ref[0, 0]
    o_ref[...] = val.astype(o_ref.dtype)                              # (TB, 1)


def _round_up(x, m):
    return ((x + m - 1) // m) * m


def critic_forward(obs, params, *, block_b=None):
    """obs: (B, D) float32 -> value (B, 1) float32."""
    w1, b1, w2, b2, w3, b3 = params
    B, D = obs.shape
    H = w1.shape[1]

    if block_b is None:
        b128 = _round_up(B, 128)
        if b128 >= 256:
            # Aim for >= 2 tiles so the "parallel" batch axis feeds both
            # TensorCores on v7x; cap at 4096 rows (see VMEM budget above).
            block_b = _round_up(b128 // 2, 128)
        else:
            block_b = b128
        block_b = min(block_b, 4096)
    else:
        block_b = max(128, _round_up(block_b, 128))
    n_tiles = pl.cdiv(B, block_b)

    # Weights are tiny and reused by every grid step: cast once in the wrapper.
    w1_bf = w1.astype(jnp.bfloat16)
    w2_bf = w2.astype(jnp.bfloat16)
    w3_col = w3.reshape(H, 1).astype(jnp.bfloat16)     # (H,1) column for MXU
    b3_s = b3.reshape(1, 1).astype(jnp.float32)        # lone scalar -> SMEM

    const2 = lambda i: (0, 0)                          # weights: VMEM-resident

    flops = 2 * B * (D * H + H * H + H)
    bytes_accessed = (B * D * 4                        # obs (f32, read in-kernel)
                      + (D * H + H * H + H) * 2        # w1, w2, w3 (bf16)
                      + (2 * H + 1) * 4                # b1, b2, b3 (f32)
                      + B * 4)                         # output (f32)

    out = pl.pallas_call(
        _critic_mlp_kernel,
        out_shape=jax.ShapeDtypeStruct((B, 1), jnp.float32),
        grid=(n_tiles,),
        in_specs=[
            pl.BlockSpec((block_b, D), lambda i: (i, 0)),            # obs tile
            pl.BlockSpec((D, H), const2),                            # w1
            pl.BlockSpec((1, H), const2),                            # b1
            pl.BlockSpec((H, H), const2),                            # w2
            pl.BlockSpec((1, H), const2),                            # b2
            pl.BlockSpec((H, 1), const2),                            # w3 (col)
            pl.BlockSpec(memory_space=pltpu.MemorySpace.SMEM),       # b3 scalar
        ],
        out_specs=pl.BlockSpec((block_b, 1), lambda i: (i, 0)),
        compiler_params=pltpu.CompilerParams(
            dimension_semantics=("parallel",),
            # ~13 MiB worst case at block_b=4096, H=128; 48 MiB leaves headroom
            # on v7x (64 MiB physical) and is well inside v5e/v6e (128 MiB).
            vmem_limit_bytes=48 * 1024 * 1024),
        cost_estimate=pl.CostEstimate(flops=flops, transcendentals=0,
                                      bytes_accessed=bytes_accessed),
    )(obs.astype(jnp.float32), w1_bf, b1, w2_bf, b2, w3_col, b3_s)

    return out


def init_params(key, d_in, hidden, out_size=1):
    """Deterministic init mimicking torch.nn.Linear default (U[-1/sqrt(fan_in), +])."""
    ks = jax.random.split(key, 6)

    def lin(kw, kb, fan_in, fan_out):
        bound = 1.0 / jnp.sqrt(jnp.float32(fan_in))
        w = jax.random.uniform(kw, (fan_in, fan_out), jnp.float32, -bound, bound)
        b = jax.random.uniform(kb, (1, fan_out), jnp.float32, -bound, bound)
        return w, b

    w1, b1 = lin(ks[0], ks[1], d_in, hidden)
    w2, b2 = lin(ks[2], ks[3], hidden, hidden)
    w3, b3 = lin(ks[4], ks[5], hidden, out_size)
    return (w1, b1, w2, b2, w3, b3)


def reference_forward(obs, params):
    """Plain-JAX reference mirroring the kernel arithmetic (bf16 MXU inputs, f32 acc)."""
    w1, b1, w2, b2, w3, b3 = params
    x = obs.astype(jnp.bfloat16)
    h1 = jnp.dot(x, w1.astype(jnp.bfloat16), preferred_element_type=jnp.float32)
    h1 = jnp.maximum(h1 + b1, 0.0)
    h2 = jnp.dot(h1.astype(jnp.bfloat16), w2.astype(jnp.bfloat16),
                 preferred_element_type=jnp.float32)
    h2 = jnp.maximum(h2 + b2, 0.0)
    return jnp.dot(h2.astype(jnp.bfloat16), w3.astype(jnp.bfloat16),
                   preferred_element_type=jnp.float32) + b3


def reference_forward_f32(obs, params):
    """Pure f32 reference matching the PyTorch Critic numerics."""
    w1, b1, w2, b2, w3, b3 = params
    h1 = jnp.maximum(obs @ w1 + b1, 0.0)
    h2 = jnp.maximum(h1 @ w2 + b2, 0.0)
    return h2 @ w3 + b3


if __name__ == "__main__":
    key = jax.random.PRNGKey(0)
    k_obs, k_par, k_obs2 = jax.random.split(key, 3)

    D, H = 32, 128                       # hidden rounded to a 128-lane multiple
    params = init_params(k_par, D, H, out_size=1)

    # --- small-batch check (B=2, single partial tile) ---
    B = 2
    obs = jax.random.normal(k_obs, (B, D), jnp.float32)
    value = critic_forward(obs, params)
    jax.block_until_ready(value)
    assert value.shape == (B, 1)
    ref = reference_forward(obs, params)
    assert jnp.allclose(value, ref, atol=2e-3, rtol=2e-3)
    # Also compare against the true f32 model (bf16 MXU inputs diverge ~1e-2).
    ref_f32 = reference_forward_f32(obs, params)
    assert jnp.allclose(value, ref_f32, atol=1e-1, rtol=1e-1)

    # --- multi-tile check (B not a multiple of the tile; auto block_b gives
    #     a 2-tile grid with a masked ragged tail, no host-side padding) ---
    B2 = 300
    obs2 = jax.random.normal(k_obs2, (B2, D), jnp.float32)
    value2 = critic_forward(obs2, params)
    jax.block_until_ready(value2)
    assert value2.shape == (B2, 1)
    ref2 = reference_forward(obs2, params)
    assert jnp.allclose(value2, ref2, atol=2e-3, rtol=2e-3)

    print("KERNEL_OK")
</pallas_src>

<mosaic_0001>
module attributes {stable_mosaic.version = 11 : i64} {
  func.func @_critic_mlp_kernel(%arg0: i32, %arg1: memref<128x32xf32, #tpu.memory_space<vmem>>, %arg2: memref<32x128xbf16, #tpu.memory_space<vmem>>, %arg3: memref<1x128xf32, #tpu.memory_space<vmem>>, %arg4: memref<128x128xbf16, #tpu.memory_space<vmem>>, %arg5: memref<1x128xf32, #tpu.memory_space<vmem>>, %arg6: memref<128x1xbf16, #tpu.memory_space<vmem>>, %arg7: memref<1x1xf32, #tpu.memory_space<smem>>, %arg8: memref<128x1xf32, #tpu.memory_space<vmem>>) attributes {dimension_semantics = [#tpu.dimension_semantics<parallel>], iteration_bounds = array<i64: 1>, scalar_prefetch = 0 : i64, scratch_operands = 0 : i64, tpu.core_type = #tpu.core_type<tc>, window_params = [{transform_indices = @transform_0, window_bounds = array<i64: 128, 32>}, {pipeline_mode = #tpu.pipeline_mode<synchronous>, transform_indices = @transform_1, window_bounds = array<i64: 32, 128>}, {pipeline_mode = #tpu.pipeline_mode<synchronous>, transform_indices = @transform_2, window_bounds = array<i64: 1, 128>}, {pipeline_mode = #tpu.pipeline_mode<synchronous>, transform_indices = @transform_3, window_bounds = array<i64: 128, 128>}, {pipeline_mode = #tpu.pipeline_mode<synchronous>, transform_indices = @transform_4, window_bounds = array<i64: 1, 128>}, {pipeline_mode = #tpu.pipeline_mode<synchronous>, transform_indices = @transform_5, window_bounds = array<i64: 128, 1>}, {transform_indices = @transform_6, window_bounds = array<i64: 1, 1>}, {transform_indices = @transform_7, window_bounds = array<i64: 128, 1>}]} {
    %c0 = arith.constant 0 : index
    %c0_0 = arith.constant 0 : index
    %0 = vector.load %arg1[%c0, %c0_0] : memref<128x32xf32, #tpu.memory_space<vmem>>, vector<128x32xf32>
    %1 = arith.truncf %0 : vector<128x32xf32> to vector<128x32xbf16>
    %c0_1 = arith.constant 0 : index
    %c0_2 = arith.constant 0 : index
    %2 = vector.load %arg2[%c0_1, %c0_2] : memref<32x128xbf16, #tpu.memory_space<vmem>>, vector<32x128xbf16>
    %cst = arith.constant dense<0.000000e+00> : vector<128x128xf32>
    %3 = tpu.matmul %1, %2, %cst {dimension_numbers = #tpu.dot_dimension_numbers<[1], [0], [0], [1], [0, 0, 1, 1], [], []>} : vector<128x32xbf16>, vector<32x128xbf16>, vector<128x128xf32> -> vector<128x128xf32>
    %c0_3 = arith.constant 0 : index
    %c0_4 = arith.constant 0 : index
    %4 = vector.load %arg3[%c0_3, %c0_4] : memref<1x128xf32, #tpu.memory_space<vmem>>, vector<1x128xf32>
    %5 = vector.broadcast %4 : vector<1x128xf32> to vector<128x128xf32>
    %6 = arith.addf %3, %5 : vector<128x128xf32>
    %cst_5 = arith.constant 0.000000e+00 : f32
    %7 = vector.broadcast %cst_5 : f32 to vector<128x128xf32>
    %8 = arith.maximumf %6, %7 : vector<128x128xf32>
    %9 = arith.truncf %8 : vector<128x128xf32> to vector<128x128xbf16>
    %c0_6 = arith.constant 0 : index
    %c0_7 = arith.constant 0 : index
    %10 = vector.load %arg4[%c0_6, %c0_7] : memref<128x128xbf16, #tpu.memory_space<vmem>>, vector<128x128xbf16>
    %cst_8 = arith.constant dense<0.000000e+00> : vector<128x128xf32>
    %11 = tpu.matmul %9, %10, %cst_8 {dimension_numbers = #tpu.dot_dimension_numbers<[1], [0], [0], [1], [0, 0, 1, 1], [], []>} : vector<128x128xbf16>, vector<128x128xbf16>, vector<128x128xf32> -> vector<128x128xf32>
    %c0_9 = arith.constant 0 : index
    %c0_10 = arith.constant 0 : index
    %12 = vector.load %arg5[%c0_9, %c0_10] : memref<1x128xf32, #tpu.memory_space<vmem>>, vector<1x128xf32>
    %13 = vector.broadcast %12 : vector<1x128xf32> to vector<128x128xf32>
    %14 = arith.addf %11, %13 : vector<128x128xf32>
    %cst_11 = arith.constant 0.000000e+00 : f32
    %15 = vector.broadcast %cst_11 : f32 to vector<128x128xf32>
    %16 = arith.maximumf %14, %15 : vector<128x128xf32>
    %17 = arith.truncf %16 : vector<128x128xf32> to vector<128x128xbf16>
    %c0_12 = arith.constant 0 : index
    %c0_13 = arith.constant 0 : index
    %18 = vector.load %arg6[%c0_12, %c0_13] : memref<128x1xbf16, #tpu.memory_space<vmem>>, vector<128x1xbf16>
    %cst_14 = arith.constant dense<0.000000e+00> : vector<128x1xf32>
    %19 = tpu.matmul %17, %18, %cst_14 {dimension_numbers = #tpu.dot_dimension_numbers<[1], [0], [0], [1], [0, 0, 1, 1], [], []>} : vector<128x128xbf16>, vector<128x1xbf16>, vector<128x1xf32> -> vector<128x1xf32>
    %c0_15 = arith.constant 0 : index
    %c0_16 = arith.constant 0 : index
    %20 = memref.load %arg7[%c0_15, %c0_16] : memref<1x1xf32, #tpu.memory_space<smem>>
    %21 = vector.broadcast %20 : f32 to vector<128x1xf32>
    %22 = arith.addf %19, %21 : vector<128x1xf32>
    %c0_17 = arith.constant 0 : index
    %c0_18 = arith.constant 0 : index
    %23 = vector.load %arg8[%c0_17, %c0_18] : memref<128x1xf32, #tpu.memory_space<vmem>>, vector<128x1xf32>
    tpu.vector_store %arg8[%c0_17, %c0_18], %22 {strides = array<i32>} : memref<128x1xf32, #tpu.memory_space<vmem>>, vector<128x1xf32>,
    return
  }
  func.func @transform_0(%arg0: i32) -> (i32, i32) {
    %c0_i32 = arith.constant 0 : i32
    %c0_i32_0 = arith.constant 0 : i32
    return %arg0, %c0_i32 : i32, i32
  }
  func.func @transform_1(%arg0: i32) -> (i32, i32) {
    %c0_i32 = arith.constant 0 : i32
    %c0_i32_0 = arith.constant 0 : i32
    %c0_i32_1 = arith.constant 0 : i32
    return %c0_i32, %c0_i32_0 : i32, i32
  }
  func.func @transform_2(%arg0: i32) -> (i32, i32) {
    %c0_i32 = arith.constant 0 : i32
    %c0_i32_0 = arith.constant 0 : i32
    %c0_i32_1 = arith.constant 0 : i32
    return %c0_i32, %c0_i32_0 : i32, i32
  }
  func.func @transform_3(%arg0: i32) -> (i32, i32) {
    %c0_i32 = arith.constant 0 : i32
    %c0_i32_0 = arith.constant 0 : i32
    %c0_i32_1 = arith.constant 0 : i32
    return %c0_i32, %c0_i32_0 : i32, i32
  }
  func.func @transform_4(%arg0: i32) -> (i32, i32) {
    %c0_i32 = arith.constant 0 : i32
    %c0_i32_0 = arith.constant 0 : i32
    %c0_i32_1 = arith.constant 0 : i32
    return %c0_i32, %c0_i32_0 : i32, i32
  }
  func.func @transform_5(%arg0: i32) -> (i32, i32) {
    %c0_i32 = arith.constant 0 : i32
    %c0_i32_0 = arith.constant 0 : i32
    %c0_i32_1 = arith.constant 0 : i32
    return %c0_i32, %c0_i32_0 : i32, i32
  }
  func.func @transform_6(%arg0: i32) -> (i32, i32) {
    %c0_i32 = arith.constant 0 : i32
    %c0_i32_0 = arith.constant 0 : i32
    %c0_i32_1 = arith.constant 0 : i32
    return %c0_i32, %c0_i32_0 : i32, i32
  }
  func.func @transform_7(%arg0: i32) -> (i32, i32) {
    %c0_i32 = arith.constant 0 : i32
    %c0_i32_0 = arith.constant 0 : i32
    return %arg0, %c0_i32 : i32, i32
  }
}

</mosaic_0001>

<bundles_post_ra>
// kernel: tpu_custom_call.1
= control target key start
LH: loop header
LB: loop body
LE: loop exit
PB: predicated region body
PF: predicated region fallthrough
CT: control target
= control target key end

     0   :  { %13 = vsyncpa [#allocation4], 0  ;;  %s846_s24 = smov [#allocation3]   ;;  %s1008_s0 = inlined_call_operand.vmem [shape: f32[2,32], index: 0, kind: input, shape index: {}]   ;;  %s1009_s1 = inlined_call_operand.hbm [shape: bf16[32,128], index: 1, kind: input, shape index: {}]   ;;  %s1010_s2 = inlined_call_operand.vmem [shape: f32[1,128], index: 2, kind: input, shape index: {}]   ;;  %s1011_s3 = inlined_call_operand.vmem [shape: bf16[128,128], index: 3, kind: input, shape index: {}]   ;;  %s1012_s4 = inlined_call_operand.vmem [shape: f32[1,128], index: 4, kind: input, shape index: {}]   ;;  %s1013_s5 = inlined_call_operand.vmem [shape: bf16[128,1], index: 5, kind: input, shape index: {}]   ;;  %s1014_s6 = inlined_call_operand.<no memory space> [shape: f32[1,1], index: 6, kind: input, shape index: {}]   ;;  %s1015_s7 = inlined_call_operand.vmem [shape: f32[2,1], index: 7, kind: output, shape index: {}]  }
   0x1   :  { %s21_s25 = sshll.u32 %s846_s24, 4  ;;  %s22_s25 = int_to_ptr.vmem [resolvable:$true] %s21_s25 }
   0x2   :  { %s832_s26 = scalar_lea.vmem %s22_s25, 256  ;;  %p837_p1 = scmp.lt.s32.totalorder %s22_s25, %s22_s25 }
   0x3   :  { %p833_p0 = scmp.ne.s32.totalorder %s22_s25, %s832_s26  ;;  %p838_p2 = scmp.lt.s32.totalorder %s832_s26, %s832_s26 }
   0x5   :  { %p839_p3 = por %p838_p2, %p837_p1 }
   0x7   :  { %p840_p4 = pnand %p839_p3, %p833_p0 }
   0x9   :  { %843 = shalt.err (!%p840_p4)
}
   0xa   :  { %s847_s27 = smov 64   ;;  %s848_s28 = smov 4  }
   0xb   :  { %27 = dma.hbm_to_vmem [thread:$0]  %s1009_s1, 256, %s22_s25, [#allocation4], %s847_s27, %s847_s27, %s848_s28  }
   0xc   :  { %844 = dma.done.wait [#allocation4], 256  }
   0xd   :  { %845 = vsyncadd [#allocation4], 4294967040  ;;  %v806_v0 = vld [vmem:[#allocation3 + $0x8] sm:$0xff]   ;;  %v807_v1 = vld [vmem:[#allocation3] sm:$0xff]   ;;  %vm89_vm0 = vcmask 261120   ;;  %vm590_vm1 = vcmask 7168  }
   0xe   :  { %719 = vmatprep.subr.bf16.mxu0 %v806_v0  ;;  %v42_v2 = vld [vmem:[%s1008_s0] sm:$0xff]  ;;  %v43_v3 = vld [vmem:[%s1008_s0 + $0x8] sm:$0xff]  ;;  %v44_v5 = vld [vmem:[%s1008_s0 + $0x10] sm:$0xff] }
   0xf   :  { %720 = vmatpush3.bf16.msra.mxu0 %v806_v0  ;;  %v58_v4 = vpack.c.bf16 %v43_v3, %v42_v2  ;;  %v45_v6 = vld [vmem:[%s1008_s0 + $0x18] sm:$0xff]  ;;  %v46_v7 = vld [vmem:[%s1008_s0 + $0x20] sm:$0xff]  ;;  %v47_v8 = vld [vmem:[%s1008_s0 + $0x28] sm:$0xff] }
  0x10   :  { %721 = vmatprep.subr.bf16.mxu0 %v807_v1  ;;  %v59_v9 = vpack.c.bf16 %v45_v6, %v44_v5  ;;  %v60_v10 = vpack.c.bf16 %v47_v8, %v46_v7  ;;  %v808_v11 = vld [vmem:[%s1011_s3 + $0x38] sm:$0xff]   ;;  %v48_v12 = vld [vmem:[%s1008_s0 + $0x30] sm:$0xff]  ;;  %v50_v15 = vld [vmem:[%s1008_s0 + $0x40] sm:$0xff] }
  0x11   :  { %723 = vmatprep.mubr.msk.bf16.mxu0 %vm89_vm0, %v58_v4  ;;  %v49_v13 = vld [vmem:[%s1008_s0 + $0x38] sm:$0xff]  ;;  %v809_v14 = vld [vmem:[%s1011_s3 + $0x30] sm:$0xff]   ;;  %739 = vmatprep.subr.bf16.mxu1 %v808_v11  ;;  %v51_v16 = vld [vmem:[%s1008_s0 + $0x48] sm:$0xff] }
  0x12   :  { %740 = vmatpush3.bf16.msra.mxu1 %v808_v11  ;;  %v810_v17 = vld [vmem:[%s1011_s3 + $0x28] sm:$0xff]   ;;  %v61_v18 = vpack.c.bf16 %v49_v13, %v48_v12  ;;  %v811_v19 = vld [vmem:[%s1011_s3 + $0x20] sm:$0xff]   ;;  %v62_v20 = vpack.c.bf16 %v51_v16, %v50_v15  ;;  %v52_v21 = vld [vmem:[%s1008_s0 + $0x50] sm:$0xff] }
  0x13   :  { %722 = vmatpush3.bf16.msra.mxu0 %v807_v1  ;;  %741 = vmatprep.subr.bf16.mxu1 %v809_v14  ;;  %v53_v22 = vld [vmem:[%s1008_s0 + $0x58] sm:$0xff]  ;;  %v54_v23 = vld [vmem:[%s1008_s0 + $0x60] sm:$0xff]  ;;  %v55_v24 = vld [vmem:[%s1008_s0 + $0x68] sm:$0xff] }
  0x14   :  { %v812_v25 = vld [vmem:[%s1011_s3 + $0x18] sm:$0xff]   ;;  %v63_v26 = vpack.c.bf16 %v53_v22, %v52_v21  ;;  %v64_v27 = vpack.c.bf16 %v55_v24, %v54_v23  ;;  %v56_v28 = vld [vmem:[%s1008_s0 + $0x70] sm:$0xff]  ;;  %v814_v32 = vld [vmem:[%s1011_s3 + $0x8] sm:$0xff]  }
  0x15   :  { %v57_v29 = vld [vmem:[%s1008_s0 + $0x78] sm:$0xff]  ;;  %v813_v31 = vld [vmem:[%s1011_s3 + $0x10] sm:$0xff]   ;;  %v815_v33 = vld [vmem:[%s1011_s3] sm:$0xff]  }
  0x16   :  { %724 = vmatmul.mubr.msk.bf16.vlgmr.msra.gmra.mxu0 %vm89_vm0, %v59_v9  ;;  %742 = vmatpush3.bf16.msra.mxu1 %v809_v14  ;;  %v65_v30 = vpack.c.bf16 %v57_v29, %v56_v28  ;;  %v816_v34 = vld [vmem:[%s1013_s5 + $0x38] sm:$0xff]   ;;  %v817_v35 = vld [vmem:[%s1013_s5 + $0x30] sm:$0xff]   ;;  %v818_v36 = vld [vmem:[%s1013_s5 + $0x28] sm:$0xff]  }
  0x17   :  { %727 = vmatprep.mubr.msk.bf16.mxu0 %vm89_vm0, %v60_v10  ;;  %743 = vmatprep.subr.bf16.mxu1 %v810_v17  ;;  %v819_v37 = vld [vmem:[%s1013_s5 + $0x20] sm:$0xff]   ;;  %v820_v38 = vld [vmem:[%s1013_s5 + $0x18] sm:$0xff]  }
  0x18   :  { %771 = vmatprep.subr.bf16.mxu0 %v816_v34  ;;  %v649_v41 = vld [vmem:[%s1010_s2] ss:$0 sm:$0xff] }
  0x19   :  { %772 = vmatpush3.bf16.msra.mxu0 %v816_v34  ;;  %v823_v34 = vld [vmem:[%s1013_s5] sm:$0xff]  }
  0x1a   :  { %744 = vmatpush3.bf16.msra.mxu1 %v810_v17  ;;  %773 = vmatprep.subr.bf16.mxu0 %v817_v35 }
  0x1b   :  { %745 = vmatprep.subr.bf16.mxu1 %v811_v19 }
  0x1d   :  { %774 = vmatpush3.bf16.msra.mxu0 %v817_v35 }
  0x1e   :  { %728 = vmatmul.mubr.msk.bf16.gmra.mxu0 %vm89_vm0, %v61_v18  ;;  %746 = vmatpush3.bf16.msra.mxu1 %v811_v19 }
  0x1f   :  { %731 = vmatprep.mubr.msk.bf16.mxu0 %vm89_vm0, %v62_v20  ;;  %747 = vmatprep.subr.bf16.mxu1 %v812_v25 }
  0x20   :  { %775 = vmatprep.subr.bf16.mxu0 %v818_v36 }
  0x21   :  { %776 = vmatpush3.bf16.msra.mxu0 %v818_v36 }
  0x22   :  { %748 = vmatpush3.bf16.msra.mxu1 %v812_v25  ;;  %777 = vmatprep.subr.bf16.mxu0 %v819_v37 }
  0x23   :  { %749 = vmatprep.subr.bf16.mxu1 %v813_v31 }
  0x25   :  { %778 = vmatpush3.bf16.msra.mxu0 %v819_v37  ;;  %v660_v37 = vld [vmem:[%s1012_s4] ss:$0 sm:$0xff] }
  0x26   :  { %732 = vmatmul.mubr.msk.bf16.gmra.mxu0 %vm89_vm0, %v63_v26  ;;  %750 = vmatpush3.bf16.msra.mxu1 %v813_v31 }
  0x27   :  { %735 = vmatprep.mubr.msk.bf16.mxu0 %vm89_vm0, %v64_v27  ;;  %751 = vmatprep.subr.bf16.mxu1 %v814_v32 }
  0x28   :  { %779 = vmatprep.subr.bf16.mxu0 %v820_v38 }
  0x29   :  { %780 = vmatpush3.bf16.msra.mxu0 %v820_v38 }
  0x2a   :  { %752 = vmatpush3.bf16.msra.mxu1 %v814_v32  ;;  %v821_v32 = vld [vmem:[%s1013_s5 + $0x10] sm:$0xff]  }
  0x2b   :  { %753 = vmatprep.subr.bf16.mxu1 %v815_v33  ;;  %781 = vmatprep.subr.bf16.mxu0 %v821_v32 }
  0x2d   :  { %782 = vmatpush3.bf16.msra.mxu0 %v821_v32 }
  0x2e   :  { %736 = vmatmul.mubr.msk.bf16.gmra.mxu0 %vm89_vm0, %v65_v30  ;;  %754 = vmatpush3.bf16.msra.mxu1 %v815_v33  ;;  %v822_v33 = vld [vmem:[%s1013_s5 + $0x8] sm:$0xff]  }
  0x2f   :  { %783 = vmatprep.subr.bf16.mxu0 %v822_v33 }
  0x31   :  { %784 = vmatpush3.bf16.msra.mxu0 %v822_v33 }
  0x32   :  { %785 = vmatprep.subr.bf16.mxu0 %v823_v34 }
  0x35   :  { %786 = vmatpush3.bf16.msra.mxu0 %v823_v34 }
  0xd6   :  { %v725_v39 = vpop.f32.mrf.mxu0 }
  0xd7   :  { %v157_v45 = vadd.f32 %v725_v39, %v649_v41 }
  0xd8   :  { %v148_v40 = vpop.f32.mrf.mxu0 }
  0xd9   :  { %v149_v43 = vadd.f32 %v649_v41, %v148_v40  ;;  %v213_v52 = vmax.f32 %v157_v45, 0.0 }
  0xda   :  { %v726_v42 = vpop.f32.mrf.mxu0 }
  0xdb   :  { %v160_v44 = vadd.f32 %v726_v42, %v649_v41  ;;  %v211_v50 = vmax.f32 %v149_v43, 0.0 }
  0xdc   :  { %v151_v46 = vpop.f32.mrf.mxu0 }
  0xdd   :  { %v152_v47 = vadd.f32 %v649_v41, %v151_v46  ;;  %v214_v48 = vmax.f32 %v160_v44, 0.0 }
  0xde   :  { %v729_v49 = vpop.f32.mrf.mxu0 }
  0xdf   :  { %v212_v51 = vmax.f32 %v152_v47, 0.0  ;;  %v228_v55 = vpack.c.bf16 %v214_v48, %v213_v52  ;;  %v173_v59 = vadd.f32 %v729_v49, %v649_v41 }
  0xe0   :  { %v164_v53 = vpop.f32.mrf.mxu0 }
  0xe1   :  { %v227_v54 = vpack.c.bf16 %v212_v51, %v211_v50  ;;  %v165_v57 = vadd.f32 %v649_v41, %v164_v53  ;;  %v217_v2 = vmax.f32 %v173_v59, 0.0 }
  0xe2   :  { %v730_v56 = vpop.f32.mrf.mxu0 }
  0xe3   :  { %v176_v58 = vadd.f32 %v730_v56, %v649_v41  ;;  %755 = vmatprep.mubr.bf16.mxu1 %v227_v54  ;;  %v215_v0 = vmax.f32 %v165_v57, 0.0 }
  0xe4   :  { %v167_v60 = vpop.f32.mrf.mxu0  ;;  %756 = vmatmul.mubr.bf16.vlgmr.msra.gmra.mxu1 %v228_v55 }
  0xe5   :  { %v168_v61 = vadd.f32 %v649_v41, %v167_v60  ;;  %v218_v62 = vmax.f32 %v176_v58, 0.0 }
  0xe6   :  { %v733_v63 = vpop.f32.mrf.mxu0 }
  0xe7   :  { %v216_v1 = vmax.f32 %v168_v61, 0.0  ;;  %v230_v5 = vpack.c.bf16 %v218_v62, %v217_v2  ;;  %v189_v9 = vadd.f32 %v733_v63, %v649_v41 }
  0xe8   :  { %v180_v3 = vpop.f32.mrf.mxu0 }
  0xe9   :  { %v229_v4 = vpack.c.bf16 %v216_v1, %v215_v0  ;;  %v181_v7 = vadd.f32 %v649_v41, %v180_v3  ;;  %v221_v16 = vmax.f32 %v189_v9, 0.0 }
  0xea   :  { %v734_v6 = vpop.f32.mrf.mxu0 }
  0xeb   :  { %v192_v8 = vadd.f32 %v734_v6, %v649_v41  ;;  %759 = vmatprep.mubr.bf16.mxu1 %v229_v4  ;;  %v219_v14 = vmax.f32 %v181_v7, 0.0 }
  0xec   :  { %v183_v10 = vpop.f32.mrf.mxu0  ;;  %760 = vmatmul.mubr.bf16.gmra.mxu1 %v230_v5 }
  0xed   :  { %v184_v11 = vadd.f32 %v649_v41, %v183_v10  ;;  %v222_v12 = vmax.f32 %v192_v8, 0.0 }
  0xee   :  { %v737_v13 = vpop.f32.mrf.mxu0 }
  0xef   :  { %v220_v15 = vmax.f32 %v184_v11, 0.0  ;;  %v232_v19 = vpack.c.bf16 %v222_v12, %v221_v16  ;;  %v205_v23 = vadd.f32 %v737_v13, %v649_v41 }
  0xf0   :  { %v196_v17 = vpop.f32.mrf.mxu0 }
  0xf1   :  { %v231_v18 = vpack.c.bf16 %v220_v15, %v219_v14  ;;  %v197_v21 = vadd.f32 %v649_v41, %v196_v17  ;;  %v225_v29 = vmax.f32 %v205_v23, 0.0 }
  0xf2   :  { %v738_v20 = vpop.f32.mrf.mxu0 }
  0xf3   :  { %v208_v22 = vadd.f32 %v738_v20, %v649_v41  ;;  %763 = vmatprep.mubr.bf16.mxu1 %v231_v18  ;;  %v223_v27 = vmax.f32 %v197_v21, 0.0 }
  0xf4   :  { %v199_v24 = vpop.f32.mrf.mxu0  ;;  %764 = vmatmul.mubr.bf16.gmra.mxu1 %v232_v19 }
  0xf5   :  { %v200_v25 = vadd.f32 %v649_v41, %v199_v24  ;;  %v226_v26 = vmax.f32 %v208_v22, 0.0 }
  0xf7   :  { %v224_v28 = vmax.f32 %v200_v25, 0.0  ;;  %v234_v31 = vpack.c.bf16 %v226_v26, %v225_v29 }
  0xf9   :  { %v233_v30 = vpack.c.bf16 %v224_v28, %v223_v27  ;;  %v444_v28 = vstv %s1014_s6 }
  0xfb   :  { %767 = vmatprep.mubr.bf16.mxu1 %v233_v30 }
  0xfc   :  { %768 = vmatmul.mubr.bf16.gmra.mxu1 %v234_v31 }
 0x1a4   :  { %v757_v35 = vpop.f32.mrf.mxu1 }
 0x1a5   :  { %v349_v41 = vadd.f32 %v757_v35, %v660_v37 }
 0x1a6   :  { %v340_v36 = vpop.f32.mrf.mxu1 }
 0x1a7   :  { %v341_v39 = vadd.f32 %v660_v37, %v340_v36  ;;  %v405_v48 = vmax.f32 %v349_v41, 0.0 }
 0x1a8   :  { %v758_v38 = vpop.f32.mrf.mxu1 }
 0x1a9   :  { %v352_v40 = vadd.f32 %v758_v38, %v660_v37  ;;  %v403_v46 = vmax.f32 %v341_v39, 0.0 }
 0x1aa   :  { %v343_v42 = vpop.f32.mrf.mxu1 }
 0x1ab   :  { %v344_v43 = vadd.f32 %v660_v37, %v343_v42  ;;  %v406_v44 = vmax.f32 %v352_v40, 0.0 }
 0x1ac   :  { %v761_v45 = vpop.f32.mrf.mxu1 }
 0x1ad   :  { %v404_v47 = vmax.f32 %v344_v43, 0.0  ;;  %v420_v51 = vpack.c.bf16 %v406_v44, %v405_v48  ;;  %v365_v55 = vadd.f32 %v761_v45, %v660_v37 }
 0x1ae   :  { %v356_v49 = vpop.f32.mrf.mxu1 }
 0x1af   :  { %v419_v50 = vpack.c.bf16 %v404_v47, %v403_v46  ;;  %v357_v53 = vadd.f32 %v660_v37, %v356_v49  ;;  %v409_v62 = vmax.f32 %v365_v55, 0.0 }
 0x1b0   :  { %v762_v52 = vpop.f32.mrf.mxu1 }
 0x1b1   :  { %v368_v54 = vadd.f32 %v762_v52, %v660_v37  ;;  %787 = vmatprep.mubr.bf16.mxu0 %v419_v50  ;;  %v407_v60 = vmax.f32 %v357_v53, 0.0 }
 0x1b2   :  { %v359_v56 = vpop.f32.mrf.mxu1  ;;  %788 = vmatmul.mubr.bf16.vlgmr.msra.gmra.mxu0 %v420_v51 }
 0x1b3   :  { %v360_v57 = vadd.f32 %v660_v37, %v359_v56  ;;  %v410_v58 = vmax.f32 %v368_v54, 0.0 }
 0x1b4   :  { %v765_v59 = vpop.f32.mrf.mxu1 }
 0x1b5   :  { %v408_v61 = vmax.f32 %v360_v57, 0.0  ;;  %v422_v1 = vpack.c.bf16 %v410_v58, %v409_v62  ;;  %v381_v5 = vadd.f32 %v765_v59, %v660_v37 }
 0x1b6   :  { %v372_v63 = vpop.f32.mrf.mxu1 }
 0x1b7   :  { %v421_v0 = vpack.c.bf16 %v408_v61, %v407_v60  ;;  %v373_v3 = vadd.f32 %v660_v37, %v372_v63  ;;  %v413_v12 = vmax.f32 %v381_v5, 0.0 }
 0x1b8   :  { %v766_v2 = vpop.f32.mrf.mxu1 }
 0x1b9   :  { %v384_v4 = vadd.f32 %v766_v2, %v660_v37  ;;  %791 = vmatprep.mubr.bf16.mxu0 %v421_v0  ;;  %v411_v10 = vmax.f32 %v373_v3, 0.0 }
 0x1ba   :  { %v375_v6 = vpop.f32.mrf.mxu1  ;;  %792 = vmatmul.mubr.bf16.gmra.mxu0 %v422_v1 }
 0x1bb   :  { %v376_v7 = vadd.f32 %v660_v37, %v375_v6  ;;  %v414_v8 = vmax.f32 %v384_v4, 0.0 }
 0x1bc   :  { %v769_v9 = vpop.f32.mrf.mxu1 }
 0x1bd   :  { %v412_v11 = vmax.f32 %v376_v7, 0.0  ;;  %v424_v15 = vpack.c.bf16 %v414_v8, %v413_v12  ;;  %v397_v19 = vadd.f32 %v769_v9, %v660_v37 }
 0x1be   :  { %v388_v13 = vpop.f32.mrf.mxu1 }
 0x1bf   :  { %v423_v14 = vpack.c.bf16 %v412_v11, %v411_v10  ;;  %v389_v17 = vadd.f32 %v660_v37, %v388_v13  ;;  %v417_v25 = vmax.f32 %v397_v19, 0.0 }
 0x1c0   :  { %v770_v16 = vpop.f32.mrf.mxu1 }
 0x1c1   :  { %v400_v18 = vadd.f32 %v770_v16, %v660_v37  ;;  %795 = vmatprep.mubr.bf16.mxu0 %v423_v14  ;;  %v415_v23 = vmax.f32 %v389_v17, 0.0 }
 0x1c2   :  { %v391_v20 = vpop.f32.mrf.mxu1  ;;  %796 = vmatmul.mubr.bf16.gmra.mxu0 %v424_v15 }
 0x1c3   :  { %v392_v21 = vadd.f32 %v660_v37, %v391_v20  ;;  %v418_v22 = vmax.f32 %v400_v18, 0.0 }
 0x1c5   :  { %v416_v24 = vmax.f32 %v392_v21, 0.0  ;;  %v426_v27 = vpack.c.bf16 %v418_v22, %v417_v25 }
 0x1c7   :  { %v425_v26 = vpack.c.bf16 %v416_v24, %v415_v23 }
 0x1c9   :  { %799 = vmatprep.mubr.bf16.mxu0 %v425_v26 }
 0x1ca   :  { %800 = vmatmul.mubr.bf16.gmra.mxu0 %v426_v27 }
 0x272   :  { %v789_v29 = vpop.f32.mrf.mxu0 }
 0x274   :  { %v527_v30 = vpop.f32.mrf.mxu0 }
 0x275   :  { %v528_v31 = vadd.f32 %v527_v30, %v444_v28 }
 0x276   :  { %v790_v32 = vpop.f32.mrf.mxu0 }
 0x277   :  { %591 = vst.msk [vmem:[#allocation5] sm:$0xff] %vm590_vm1, %v528_v31 }
 0x278   :  { %v530_v33 = vpop.f32.mrf.mxu0 }
 0x27a   :  { %v793_v34 = vpop.f32.mrf.mxu0 }
 0x27c   :  { %v543_v35 = vpop.f32.mrf.mxu0 }
 0x27e   :  { %v625_v36 = vld [vmem:[#allocation5] sm:$0x3]  ;;  %v794_v37 = vpop.f32.mrf.mxu0 }
 0x27f   :  { %626 = vst [vmem:[%s1015_s7] sm:$0x3] %v625_v36 }
 0x280   :  { %v546_v38 = vpop.f32.mrf.mxu0 }
 0x282   :  { %v797_v39 = vpop.f32.mrf.mxu0 }
 0x284   :  { %v559_v40 = vpop.f32.mrf.mxu0 }
 0x286   :  { %v798_v41 = vpop.f32.mrf.mxu0 }
 0x288   :  { %v562_v42 = vpop.f32.mrf.mxu0 }
 0x28a   :  { %v801_v43 = vpop.f32.mrf.mxu0 }
 0x28c   :  { %v575_v44 = vpop.f32.mrf.mxu0 }
 0x28e   :  { %v802_v45 = vpop.f32.mrf.mxu0 }
 0x290   :  { %v578_v46 = vpop.f32.mrf.mxu0 }
 0x291   :  { %644 = vsyncpa [#allocation4], 1 }

</bundles_post_ra>
